<compile_context>
chip_gen: v7x
topology: tpu7x:2x2x1
jax: 0.10.0
libtpu: 0.0.40
codegen_flags: <defaults>
</compile_context>

<pallas_src>
import jax
import jax.numpy as jnp
from jax.experimental import pallas as pl
from jax.experimental.pallas import tpu as pltpu


# ---------------------------------------------------------------------------
# forward(x) = emb_weight[:sl]
# ---------------------------------------------------------------------------
def _make_copy_rows_kernel(row_ranges):
    """Build a kernel that copies the given static (start, size) row ranges
    from the HBM table straight into the HBM output with one DMA descriptor
    per range (all started before any wait -> concurrent descriptors)."""

    def kernel(emb_hbm, out_hbm, sems):
        copies = []
        for i, (start, size) in enumerate(row_ranges):
            cp = pltpu.make_async_copy(
                emb_hbm.at[pl.ds(start, size), :],
                out_hbm.at[pl.ds(start, size), :],
                sems.at[i],
            )
            cp.start()
            copies.append(cp)
        for cp in copies:
            cp.wait()

    return kernel


def learned_position_embeddings_fwd(x, emb_weight, *, max_dma=8,
                                    split_bytes=4 << 20):
    """Pallas equivalent of LearnedPositionEmbeddings.forward.

    x:          (batch, seq) array (only seq = x.shape[1] is used)
    emb_weight: (seq_len, model_dim) embedding table
    returns:    (sl, model_dim) = emb_weight[:sl]

    Works for any sl <= seq_len (no tile-multiple restriction): the forward is
    one (or a few, for large sl*model_dim) direct HBM->HBM DMA(s).
    """
    sl = x.shape[1]
    seq_len, model_dim = emb_weight.shape
    assert sl <= seq_len

    itemsize = jnp.dtype(emb_weight.dtype).itemsize
    total_bytes = sl * model_dim * itemsize

    # v7x-oriented split: one descriptor rarely saturates ~3.2 TB/s HBM, so
    # for large copies issue several concurrent row-range DMAs.  Keep each
    # chunk start aligned to the dtype's sublane tile (8 rows for f32,
    # 16 for bf16, ...) so every descriptor is a unit-stride full-tile copy.
    if total_bytes < split_bytes:
        n_dma = 1
    else:
        n_dma = min(max_dma, pl.cdiv(total_bytes, split_bytes))
    sub = max(8, 8 * (4 // itemsize))                  # rows per sublane tile
    rows_per = max(sub, ((pl.cdiv(sl, n_dma) + sub - 1) // sub) * sub)
    row_ranges = []
    start = 0
    while start < sl:
        size = min(rows_per, sl - start)
        row_ranges.append((start, size))
        start += size
    n_dma = len(row_ranges)

    return pl.pallas_call(
        _make_copy_rows_kernel(tuple(row_ranges)),
        out_shape=jax.ShapeDtypeStruct((sl, model_dim), emb_weight.dtype),
        in_specs=[pl.BlockSpec(memory_space=pl.ANY)],   # table stays in HBM
        out_specs=pl.BlockSpec(memory_space=pl.ANY),    # output written by DMA
        scratch_shapes=[pltpu.SemaphoreType.DMA((n_dma,))],
        cost_estimate=pl.CostEstimate(
            flops=0, transcendentals=0,
            bytes_accessed=2 * total_bytes),            # read table + write out
    )(emb_weight)


# ---------------------------------------------------------------------------
# get_fixed_embedding(ind) = emb_weight[ind][None, None, :]
# ---------------------------------------------------------------------------
def _gather_row_kernel(ind_ref, emb_hbm, out_hbm, sem):
    # Data-dependent row gather: one dynamic-offset HBM->HBM DMA straight into
    # the output ref (no intermediate VMEM buffer, no buf->out copy).
    row = ind_ref[0]
    cp = pltpu.make_async_copy(emb_hbm.at[pl.ds(row, 1), :], out_hbm, sem)
    cp.start()
    cp.wait()


def get_fixed_embedding(ind, emb_weight):
    """Pallas equivalent of get_fixed_embedding: returns (1, 1, model_dim).

    `ind` should already be a device int32 array of shape (1,) (or a traced
    scalar) to avoid a per-call host->device transfer on the decode path;
    plain Python ints are accepted for convenience.
    """
    seq_len, model_dim = emb_weight.shape
    itemsize = jnp.dtype(emb_weight.dtype).itemsize

    if isinstance(ind, jax.Array) and ind.ndim == 1:
        ind_arr = ind.astype(jnp.int32)
    else:
        ind_arr = jnp.reshape(jnp.asarray(ind, dtype=jnp.int32), (1,))
    # TODO(synk): no graceful bounds check on `ind`; an out-of-range index
    # trips the default DMA bounds check at runtime rather than erroring early.

    out = pl.pallas_call(
        _gather_row_kernel,
        out_shape=jax.ShapeDtypeStruct((1, model_dim), emb_weight.dtype),
        in_specs=[
            pl.BlockSpec(memory_space=pltpu.SMEM),   # index scalar in SMEM
            pl.BlockSpec(memory_space=pl.ANY),       # table stays in HBM
        ],
        out_specs=pl.BlockSpec(memory_space=pl.ANY), # output written by DMA
        scratch_shapes=[pltpu.SemaphoreType.DMA(())],
        cost_estimate=pl.CostEstimate(
            flops=0, transcendentals=0,
            bytes_accessed=2 * model_dim * itemsize),
    )(ind_arr, emb_weight)
    return out[None, ...]  # (1, 1, model_dim), matching .unsqueeze(0)


if __name__ == "__main__":
    key = jax.random.PRNGKey(0)
    k_emb, k_x = jax.random.split(key)

    # Module config (small, lane-aligned): seq_len=16 positions, model_dim=128.
    seq_len, model_dim, init = 16, 128, 0.02
    emb_weight = init * jax.random.normal(k_emb, (seq_len, model_dim),
                                          dtype=jnp.float32)

    # Input: batch=2, seq=8 token ids (values irrelevant to the forward).
    batch, sl = 2, 8
    x = jax.random.randint(k_x, (batch, sl), 0, seq_len, dtype=jnp.int32)

    out = jax.block_until_ready(learned_position_embeddings_fwd(x, emb_weight))
    assert out.shape == (sl, model_dim)
    assert jnp.allclose(out, emb_weight[:sl])

    # Arbitrary (non-multiple-of-8) sequence lengths also work.
    x_odd = jax.random.randint(k_x, (batch, 5), 0, seq_len, dtype=jnp.int32)
    out_odd = jax.block_until_ready(
        learned_position_embeddings_fwd(x_odd, emb_weight))
    assert out_odd.shape == (5, model_dim)
    assert jnp.allclose(out_odd, emb_weight[:5])

    # get_fixed_embedding with a device-resident int32 index (decode path).
    ind_dev = jnp.asarray([3], dtype=jnp.int32)
    fixed = jax.block_until_ready(get_fixed_embedding(ind_dev, emb_weight))
    assert fixed.shape == (1, 1, model_dim)
    assert jnp.allclose(fixed[0, 0], emb_weight[3])

    print("KERNEL_OK")
</pallas_src>

<mosaic_0001>
module attributes {stable_mosaic.version = 11 : i64} {
  func.func @kernel(%arg0: memref<16x128xf32, #tpu.memory_space<any>>, %arg1: memref<8x128xf32, #tpu.memory_space<any>>, %arg2: memref<1x!tpu.dma_semaphore, #tpu.memory_space<semaphore_mem>>) attributes {dimension_semantics = [], scalar_prefetch = 0 : i64, scratch_operands = 1 : i64, tpu.core_type = #tpu.core_type<tc>} {
    %c0_i32 = arith.constant 0 : i32
    %c0_i32_0 = arith.constant 0 : i32
    %c0_i32_1 = arith.constant 0 : i32
    %0 = tpu.memref_slice %arg0[%c0_i32_0, %c0_i32_1] : memref<16x128xf32, #tpu.memory_space<any>> -> memref<8x128xf32, #tpu.memory_space<any>>
    %c0_i32_2 = arith.constant 0 : i32
    %c0_i32_3 = arith.constant 0 : i32
    %1 = tpu.memref_slice %arg1[%c0_i32_2, %c0_i32_3] : memref<8x128xf32, #tpu.memory_space<any>> -> memref<8x128xf32, #tpu.memory_space<any>>
    %2 = tpu.memref_slice %arg2[%c0_i32] : memref<1x!tpu.dma_semaphore, #tpu.memory_space<semaphore_mem>> -> memref<1x!tpu.dma_semaphore, #tpu.memory_space<semaphore_mem>>
    %3 = tpu.memref_squeeze %2 : memref<1x!tpu.dma_semaphore, #tpu.memory_space<semaphore_mem>> -> memref<!tpu.dma_semaphore, #tpu.memory_space<semaphore_mem>>
    tpu.enqueue_dma source(%0 : memref<8x128xf32, #tpu.memory_space<any>>) target(%1 : memref<8x128xf32, #tpu.memory_space<any>>) target_semaphore(%3 : memref<!tpu.dma_semaphore, #tpu.memory_space<semaphore_mem>>)
    %c0_i32_4 = arith.constant 0 : i32
    %c0_i32_5 = arith.constant 0 : i32
    %c0_i32_6 = arith.constant 0 : i32
    %4 = tpu.memref_slice %arg0[%c0_i32_5, %c0_i32_6] : memref<16x128xf32, #tpu.memory_space<any>> -> memref<8x128xf32, #tpu.memory_space<any>>
    %c0_i32_7 = arith.constant 0 : i32
    %c0_i32_8 = arith.constant 0 : i32
    %5 = tpu.memref_slice %arg1[%c0_i32_7, %c0_i32_8] : memref<8x128xf32, #tpu.memory_space<any>> -> memref<8x128xf32, #tpu.memory_space<any>>
    %6 = tpu.memref_slice %arg2[%c0_i32_4] : memref<1x!tpu.dma_semaphore, #tpu.memory_space<semaphore_mem>> -> memref<1x!tpu.dma_semaphore, #tpu.memory_space<semaphore_mem>>
    %7 = tpu.memref_squeeze %6 : memref<1x!tpu.dma_semaphore, #tpu.memory_space<semaphore_mem>> -> memref<!tpu.dma_semaphore, #tpu.memory_space<semaphore_mem>>
    tpu.wait_dma2 semaphore(%7 : memref<!tpu.dma_semaphore, #tpu.memory_space<semaphore_mem>>) src(%4 : memref<8x128xf32, #tpu.memory_space<any>>) dst(%5 : memref<8x128xf32, #tpu.memory_space<any>>)
    return
  }
}

</mosaic_0001>

<bundles_post_ra>
// kernel: tpu_custom_call.1
= control target key start
LH: loop header
LB: loop body
LE: loop exit
PB: predicated region body
PF: predicated region fallthrough
CT: control target
= control target key end

     0   :  { %s34_s6 = smov [#allocation2]   ;;  %s35_s7 = smov [#allocation3]   ;;  %s53_s0 = inlined_call_operand.hbm [shape: f32[16,128], index: 0, kind: input, shape index: {}]   ;;  %s54_s1 = inlined_call_operand.hbm [shape: f32[8,128], index: 1, kind: output, shape index: {}]  }
   0x1   :  { %s36_s8 = smov 0  }
   0x2   :  { %18 = dma.general %s53_s0, 128, %s54_s1, %s34_s6, %s35_s7, [#allocation4], %s36_s8, 0  }
   0x3   :  { %32 = dma.done.wait [#allocation2], 128 }
   0x4   :  { %33 = vsyncadd [#allocation2], 4294967168 }
   0x5   :  { %22 = vsyncmov [#allocation2] }
   0x8   :  { %s23_s13 = vpop.sfrf %22 }
   0x9   :  { %p28_p0 = scmp.ne.s32.totalorder %s23_s13, 0 }
   0xb   :  { %27 = shalt.err (%p28_p0)  }

</bundles_post_ra>
